<compile_context>
chip_gen: v7x
topology: tpu7x:2x2x1
jax: 0.10.0
libtpu: 0.0.40
codegen_flags: <defaults>
</compile_context>

<pallas_src>
import functools

import jax
import jax.numpy as jnp
from jax.experimental import pallas as pl
from jax.experimental.pallas import tpu as pltpu


def _choose_tiling(B, T, F):
    """Pick the batch-tile size (lanes) and the conv2/max-pool time chunk."""
    F2 = F // 2
    # Largest 128-lane multiple not exceeding the batch (floor 128, cap 2048).
    bt = 128 * max(1, min(16, B // 128))

    # Clamp so double-buffered input + padded bf16 scratches + transient f32
    # dot results stay well inside the requested 32 MiB VMEM limit.
    def footprint(b):
        return (2 * b * T * F * 4                 # double-buffered input tile
                + (F + F2) * (T + 2) * b * 2      # bf16 conv scratches
                + 3 * F2 * T * b * 4)             # transient f32 dot results

    while bt > 128 and footprint(bt) > 20 * 1024 * 1024:
        bt -= 128

    # Keep >= 2 grid steps when the batch allows it so both v7x TensorCores
    # get work under dimension_semantics=("parallel",).
    if B >= 256 and pl.cdiv(B, bt) < 2:
        bt = max(128, 128 * ((B // 2) // 128))

    # conv2/pool chunk: per-dot N >= ~1024 lanes, live f32 chunk <= ~32 vregs.
    pool_chunk = max(1, min(T, max(1, 1024 // bt),
                            max(1, (32 * 1024) // (F2 * bt))))
    return bt, pool_chunk


def _temporal_cnn_kernel(x_ref, w1_ref, b1_ref, w2_ref, b2_ref,
                         w3_ref, b3_ref, w4_ref, b4_ref, o_ref,
                         xs_ref, ys_ref, *, T, F, bt, pool_chunk):
    F2 = F // 2
    f32 = jnp.float32
    bf16 = jnp.bfloat16

    # ---- Zero-boundary time blocks of both padded scratches. ----
    # Done every grid step (NOT guarded by pl.when(pid==0)): scratch buffers
    # are per-TensorCore under megacore "parallel" partitioning, so the second
    # core never sees program_id 0.  The stores are tiny (4 blocks of bf16).
    xs_ref[:, 0:bt] = jnp.zeros((F, bt), bf16)
    xs_ref[:, (T + 1) * bt:(T + 2) * bt] = jnp.zeros((F, bt), bf16)
    ys_ref[:, 0:bt] = jnp.zeros((F2, bt), bf16)
    ys_ref[:, (T + 1) * bt:(T + 2) * bt] = jnp.zeros((F2, bt), bf16)

    # ---- Transpose the tile (batch -> lanes) into the padded conv1 scratch --
    # Done in groups of `tg` time steps so each XLU transpose is ~128 lanes
    # wide and no (T*F, bt) temp is materialized; results stored as bf16.
    tg = max(1, min(T, 128 // F)) if F <= 128 else 1
    t0 = 0
    while t0 < T:
        g = min(tg, T - t0)
        xt = jnp.transpose(x_ref[:, t0 * F:(t0 + g) * F])      # (g*F, bt) f32
        for j in range(g):
            xs_ref[:, (t0 + 1 + j) * bt:(t0 + 2 + j) * bt] = (
                xt[j * F:(j + 1) * F, :].astype(bf16))
        t0 += g

    # ---- Conv1d #1 (F -> F2, k=3, pad=1) + ReLU: 3 large bf16 dots ----
    # Tap k reads the lane window holding input times {t+k-1} for all t at
    # once; the zero boundary blocks supply the padding.  Single bias add.
    acc = jnp.dot(w1_ref[0], xs_ref[:, 0:T * bt],
                  preferred_element_type=f32)
    acc = acc + jnp.dot(w1_ref[1], xs_ref[:, bt:(T + 1) * bt],
                        preferred_element_type=f32)
    acc = acc + jnp.dot(w1_ref[2], xs_ref[:, 2 * bt:(T + 2) * bt],
                        preferred_element_type=f32)
    y1 = jnp.maximum(acc + b1_ref[...], 0.0)                    # (F2, T*bt) f32
    ys_ref[:, bt:(T + 1) * bt] = y1.astype(bf16)

    # ---- Conv1d #2 (k=3, pad=1) + ReLU fused with AdaptiveMaxPool1d(1) ----
    # Processed in time chunks so the (F2, T*bt) intermediate is never
    # materialized and re-read; sequential += accumulation over the 3 taps.
    pooled = None
    t0 = 0
    while t0 < T:
        c = min(pool_chunk, T - t0)
        lo = t0 * bt
        hi = (t0 + c) * bt
        acc2 = jnp.dot(w2_ref[0], ys_ref[:, lo:hi],
                       preferred_element_type=f32)
        acc2 = acc2 + jnp.dot(w2_ref[1], ys_ref[:, lo + bt:hi + bt],
                              preferred_element_type=f32)
        acc2 = acc2 + jnp.dot(w2_ref[2], ys_ref[:, lo + 2 * bt:hi + 2 * bt],
                              preferred_element_type=f32)
        y2 = jnp.maximum(acc2 + b2_ref[...], 0.0)                # (F2, c*bt) f32
        for j in range(c):
            blk = y2[:, j * bt:(j + 1) * bt]
            pooled = blk if pooled is None else jnp.maximum(pooled, blk)
        t0 += c

    # ---- Classifier: Linear -> ReLU -> (Dropout: identity) -> Linear ----
    # TODO(synk): Dropout(0.3) is identity at inference; training-mode dropout
    # (stateful PRNG masking) is not implemented here.
    h = jnp.dot(w3_ref[...], pooled.astype(bf16),
                preferred_element_type=f32)
    h = jnp.maximum(h + b3_ref[...], 0.0)                        # (F4, bt) f32
    out = jnp.dot(w4_ref[...], h.astype(bf16),
                  preferred_element_type=f32) + b4_ref[...]      # (1, bt) f32
    o_ref[...] = out.astype(o_ref.dtype)                         # lane-dense


def temporal_cnn_aggregator(frame_features, params):
    """frame_features: (B, T, F) float32 -> predictions (B, 1) float32."""
    B, T, F = frame_features.shape
    assert T >= 1 and F % 4 == 0
    F2, F4 = F // 2, F // 4

    bt, pool_chunk = _choose_tiling(B, T, F)

    # Free row-major reshape (no transpose, no extra HBM pass).  Only batches
    # smaller than one tile are padded (tiny); larger ragged batches rely on
    # Pallas partial-block masking so the big input is never copied.
    x2d = frame_features.reshape(B, T * F).astype(jnp.float32)
    if B < bt:
        x2d = jnp.pad(x2d, ((0, bt - B), (0, 0)))
    B_in = x2d.shape[0]
    num_tiles = pl.cdiv(B_in, bt)

    # One-off parameter repack (tiny, outside the kernel):
    #   conv weights -> per-tap stacks in bf16 for the MXU
    #   biases       -> f32 column vectors
    w1s = jnp.transpose(params["w1"], (2, 0, 1)).astype(jnp.bfloat16)  # (3,F2,F)
    w2s = jnp.transpose(params["w2"], (2, 0, 1)).astype(jnp.bfloat16)  # (3,F2,F2)
    w3 = params["w3"].astype(jnp.bfloat16)                             # (F4,F2)
    w4 = params["w4"].astype(jnp.bfloat16)                             # (1,F4)
    b1c = params["b1"].reshape(F2, 1).astype(jnp.float32)
    b2c = params["b2"].reshape(F2, 1).astype(jnp.float32)
    b3c = params["b3"].reshape(F4, 1).astype(jnp.float32)
    b4c = params["b4"].reshape(1, 1).astype(jnp.float32)

    def full_spec(arr):
        return pl.BlockSpec(arr.shape, lambda i, _nd=arr.ndim: (0,) * _nd)

    kernel = functools.partial(_temporal_cnn_kernel, T=T, F=F, bt=bt,
                               pool_chunk=pool_chunk)

    out = pl.pallas_call(
        kernel,
        out_shape=jax.ShapeDtypeStruct((1, B_in), jnp.float32),
        grid=(num_tiles,),
        in_specs=[
            pl.BlockSpec((bt, T * F), lambda i: (i, 0)),
            full_spec(w1s), full_spec(b1c),
            full_spec(w2s), full_spec(b2c),
            full_spec(w3), full_spec(b3c),
            full_spec(w4), full_spec(b4c),
        ],
        out_specs=pl.BlockSpec((1, bt), lambda i: (0, i)),
        scratch_shapes=[
            pltpu.VMEM((F, (T + 2) * bt), jnp.bfloat16),   # padded conv1 input
            pltpu.VMEM((F2, (T + 2) * bt), jnp.bfloat16),  # padded conv1 output
        ],
        compiler_params=pltpu.CompilerParams(
            dimension_semantics=("parallel",),
            vmem_limit_bytes=32 * 1024 * 1024),
    )(x2d, w1s, b1c, w2s, b2c, w3, b3c, w4, b4c)

    # (1, B_in) row-major -> (B_in, 1), drop padded rows.
    return out.reshape(B_in, 1)[:B]


def init_params(key, feature_dim):
    """Deterministic parameter init (PyTorch-like uniform fan-in bounds)."""
    F = feature_dim
    F2, F4 = F // 2, F // 4
    ks = jax.random.split(key, 8)

    def unif(k, shape, fan_in):
        bound = 1.0 / jnp.sqrt(float(fan_in))
        return jax.random.uniform(k, shape, jnp.float32, -bound, bound)

    return {
        # Conv1d(F, F/2, 3): weight (F2, F, 3), bias (F2,)
        "w1": unif(ks[0], (F2, F, 3), F * 3),
        "b1": unif(ks[1], (F2,), F * 3),
        # Conv1d(F/2, F/2, 3)
        "w2": unif(ks[2], (F2, F2, 3), F2 * 3),
        "b2": unif(ks[3], (F2,), F2 * 3),
        # Linear(F/2, F/4)
        "w3": unif(ks[4], (F4, F2), F2),
        "b3": unif(ks[5], (F4,), F2),
        # Linear(F/4, 1)
        "w4": unif(ks[6], (1, F4), F4),
        "b4": unif(ks[7], (1,), F4),
    }


def reference_forward(frame_features, params):
    """Pure-JAX f32 reference of the PyTorch forward (sanity check)."""
    x = jnp.transpose(frame_features, (0, 2, 1))                 # (B, F, T)
    T = x.shape[-1]

    def conv1d(xin, w, b):
        xp = jnp.pad(xin, ((0, 0), (0, 0), (1, 1)))
        out = sum(jnp.einsum("oi,bit->bot", w[:, :, k], xp[:, :, k:k + T])
                  for k in range(3))
        return out + b.reshape(1, -1, 1)

    y = jnp.maximum(conv1d(x, params["w1"], params["b1"]), 0.0)
    y = jnp.maximum(conv1d(y, params["w2"], params["b2"]), 0.0)
    pooled = jnp.max(y, axis=2)                                  # (B, F2)
    h = jnp.maximum(pooled @ params["w3"].T + params["b3"], 0.0)
    return h @ params["w4"].T + params["b4"]


if __name__ == "__main__":
    B, num_frames, feature_dim = 2, 8, 32
    key = jax.random.PRNGKey(0)
    k_x, k_p = jax.random.split(key)
    frame_features = jax.random.normal(
        k_x, (B, num_frames, feature_dim), dtype=jnp.float32)
    params = init_params(k_p, feature_dim)

    out = jax.block_until_ready(temporal_cnn_aggregator(frame_features, params))
    ref = reference_forward(frame_features, params)

    assert out.shape == (B, 1)
    # Kernel uses bf16 MXU operands with f32 accumulation -> slightly looser
    # tolerance than a pure-f32 comparison.
    assert jnp.allclose(out, ref, atol=5e-2, rtol=5e-2), (out, ref)
    print("KERNEL_OK")
</pallas_src>

<mosaic_0001>
module attributes {stable_mosaic.version = 11 : i64} {
  func.func @_temporal_cnn_kernel(%arg0: i32, %arg1: memref<128x256xf32, #tpu.memory_space<vmem>>, %arg2: memref<3x16x32xbf16, #tpu.memory_space<vmem>>, %arg3: memref<16x1xf32, #tpu.memory_space<vmem>>, %arg4: memref<3x16x16xbf16, #tpu.memory_space<vmem>>, %arg5: memref<16x1xf32, #tpu.memory_space<vmem>>, %arg6: memref<8x16xbf16, #tpu.memory_space<vmem>>, %arg7: memref<8x1xf32, #tpu.memory_space<vmem>>, %arg8: memref<1x8xbf16, #tpu.memory_space<vmem>>, %arg9: memref<1x1xf32, #tpu.memory_space<vmem>>, %arg10: memref<1x128xf32, #tpu.memory_space<vmem>>, %arg11: memref<32x1280xbf16, #tpu.memory_space<vmem>>, %arg12: memref<16x1280xbf16, #tpu.memory_space<vmem>>) attributes {dimension_semantics = [#tpu.dimension_semantics<parallel>], iteration_bounds = array<i64: 1>, scalar_prefetch = 0 : i64, scratch_operands = 2 : i64, tpu.core_type = #tpu.core_type<tc>, window_params = [{transform_indices = @transform_0, window_bounds = array<i64: 128, 256>}, {pipeline_mode = #tpu.pipeline_mode<synchronous>, transform_indices = @transform_1, window_bounds = array<i64: 3, 16, 32>}, {pipeline_mode = #tpu.pipeline_mode<synchronous>, transform_indices = @transform_2, window_bounds = array<i64: 16, 1>}, {pipeline_mode = #tpu.pipeline_mode<synchronous>, transform_indices = @transform_3, window_bounds = array<i64: 3, 16, 16>}, {pipeline_mode = #tpu.pipeline_mode<synchronous>, transform_indices = @transform_4, window_bounds = array<i64: 16, 1>}, {pipeline_mode = #tpu.pipeline_mode<synchronous>, transform_indices = @transform_5, window_bounds = array<i64: 8, 16>}, {pipeline_mode = #tpu.pipeline_mode<synchronous>, transform_indices = @transform_6, window_bounds = array<i64: 8, 1>}, {pipeline_mode = #tpu.pipeline_mode<synchronous>, transform_indices = @transform_7, window_bounds = array<i64: 1, 8>}, {pipeline_mode = #tpu.pipeline_mode<synchronous>, transform_indices = @transform_8, window_bounds = array<i64: 1, 1>}, {transform_indices = @transform_9, window_bounds = array<i64: 1, 128>}]} {
    %cst = arith.constant 0.000000e+00 : bf16
    %0 = vector.broadcast %cst : bf16 to vector<32x128xbf16>
    %c0 = arith.constant 0 : index
    %c0_0 = arith.constant 0 : index
    %1 = vector.load %arg11[%c0, %c0_0] : memref<32x1280xbf16, #tpu.memory_space<vmem>>, vector<32x128xbf16>
    tpu.vector_store %arg11[%c0, %c0_0], %0 {strides = array<i32>} : memref<32x1280xbf16, #tpu.memory_space<vmem>>, vector<32x128xbf16>,
    %cst_1 = arith.constant 0.000000e+00 : bf16
    %2 = vector.broadcast %cst_1 : bf16 to vector<32x128xbf16>
    %c0_2 = arith.constant 0 : index
    %c1152 = arith.constant 1152 : index
    %3 = vector.load %arg11[%c0_2, %c1152] : memref<32x1280xbf16, #tpu.memory_space<vmem>>, vector<32x128xbf16>
    tpu.vector_store %arg11[%c0_2, %c1152], %2 {strides = array<i32>} : memref<32x1280xbf16, #tpu.memory_space<vmem>>, vector<32x128xbf16>,
    %cst_3 = arith.constant 0.000000e+00 : bf16
    %4 = vector.broadcast %cst_3 : bf16 to vector<16x128xbf16>
    %c0_4 = arith.constant 0 : index
    %c0_5 = arith.constant 0 : index
    %5 = vector.load %arg12[%c0_4, %c0_5] : memref<16x1280xbf16, #tpu.memory_space<vmem>>, vector<16x128xbf16>
    tpu.vector_store %arg12[%c0_4, %c0_5], %4 {strides = array<i32>} : memref<16x1280xbf16, #tpu.memory_space<vmem>>, vector<16x128xbf16>,
    %cst_6 = arith.constant 0.000000e+00 : bf16
    %6 = vector.broadcast %cst_6 : bf16 to vector<16x128xbf16>
    %c0_7 = arith.constant 0 : index
    %c1152_8 = arith.constant 1152 : index
    %7 = vector.load %arg12[%c0_7, %c1152_8] : memref<16x1280xbf16, #tpu.memory_space<vmem>>, vector<16x128xbf16>
    tpu.vector_store %arg12[%c0_7, %c1152_8], %6 {strides = array<i32>} : memref<16x1280xbf16, #tpu.memory_space<vmem>>, vector<16x128xbf16>,
    %c0_9 = arith.constant 0 : index
    %c0_10 = arith.constant 0 : index
    %8 = vector.load %arg1[%c0_9, %c0_10] : memref<128x256xf32, #tpu.memory_space<vmem>>, vector<128x128xf32>
    %9 = tpu.transpose %8, [1, 0] : vector<128x128xf32> -> vector<128x128xf32>
    %10 = vector.extract_strided_slice %9 {offsets = [0, 0], sizes = [32, 128], strides = [1, 1]} : vector<128x128xf32> to vector<32x128xf32>
    %11 = arith.truncf %10 : vector<32x128xf32> to vector<32x128xbf16>
    %c0_11 = arith.constant 0 : index
    %c128 = arith.constant 128 : index
    %12 = vector.load %arg11[%c0_11, %c128] : memref<32x1280xbf16, #tpu.memory_space<vmem>>, vector<32x128xbf16>
    tpu.vector_store %arg11[%c0_11, %c128], %11 {strides = array<i32>} : memref<32x1280xbf16, #tpu.memory_space<vmem>>, vector<32x128xbf16>,
    %13 = vector.extract_strided_slice %9 {offsets = [32, 0], sizes = [32, 128], strides = [1, 1]} : vector<128x128xf32> to vector<32x128xf32>
    %14 = arith.truncf %13 : vector<32x128xf32> to vector<32x128xbf16>
    %c0_12 = arith.constant 0 : index
    %c256 = arith.constant 256 : index
    %15 = vector.load %arg11[%c0_12, %c256] : memref<32x1280xbf16, #tpu.memory_space<vmem>>, vector<32x128xbf16>
    tpu.vector_store %arg11[%c0_12, %c256], %14 {strides = array<i32>} : memref<32x1280xbf16, #tpu.memory_space<vmem>>, vector<32x128xbf16>,
    %16 = vector.extract_strided_slice %9 {offsets = [64, 0], sizes = [32, 128], strides = [1, 1]} : vector<128x128xf32> to vector<32x128xf32>
    %17 = arith.truncf %16 : vector<32x128xf32> to vector<32x128xbf16>
    %c0_13 = arith.constant 0 : index
    %c384 = arith.constant 384 : index
    %18 = vector.load %arg11[%c0_13, %c384] : memref<32x1280xbf16, #tpu.memory_space<vmem>>, vector<32x128xbf16>
    tpu.vector_store %arg11[%c0_13, %c384], %17 {strides = array<i32>} : memref<32x1280xbf16, #tpu.memory_space<vmem>>, vector<32x128xbf16>,
    %19 = vector.extract_strided_slice %9 {offsets = [96, 0], sizes = [32, 128], strides = [1, 1]} : vector<128x128xf32> to vector<32x128xf32>
    %20 = arith.truncf %19 : vector<32x128xf32> to vector<32x128xbf16>
    %c0_14 = arith.constant 0 : index
    %c512 = arith.constant 512 : index
    %21 = vector.load %arg11[%c0_14, %c512] : memref<32x1280xbf16, #tpu.memory_space<vmem>>, vector<32x128xbf16>
    tpu.vector_store %arg11[%c0_14, %c512], %20 {strides = array<i32>} : memref<32x1280xbf16, #tpu.memory_space<vmem>>, vector<32x128xbf16>,
    %c0_15 = arith.constant 0 : index
    %c128_16 = arith.constant 128 : index
    %22 = vector.load %arg1[%c0_15, %c128_16] : memref<128x256xf32, #tpu.memory_space<vmem>>, vector<128x128xf32>
    %23 = tpu.transpose %22, [1, 0] : vector<128x128xf32> -> vector<128x128xf32>
    %24 = vector.extract_strided_slice %23 {offsets = [0, 0], sizes = [32, 128], strides = [1, 1]} : vector<128x128xf32> to vector<32x128xf32>
    %25 = arith.truncf %24 : vector<32x128xf32> to vector<32x128xbf16>
    %c0_17 = arith.constant 0 : index
    %c640 = arith.constant 640 : index
    %26 = vector.load %arg11[%c0_17, %c640] : memref<32x1280xbf16, #tpu.memory_space<vmem>>, vector<32x128xbf16>
    tpu.vector_store %arg11[%c0_17, %c640], %25 {strides = array<i32>} : memref<32x1280xbf16, #tpu.memory_space<vmem>>, vector<32x128xbf16>,
    %27 = vector.extract_strided_slice %23 {offsets = [32, 0], sizes = [32, 128], strides = [1, 1]} : vector<128x128xf32> to vector<32x128xf32>
    %28 = arith.truncf %27 : vector<32x128xf32> to vector<32x128xbf16>
    %c0_18 = arith.constant 0 : index
    %c768 = arith.constant 768 : index
    %29 = vector.load %arg11[%c0_18, %c768] : memref<32x1280xbf16, #tpu.memory_space<vmem>>, vector<32x128xbf16>
    tpu.vector_store %arg11[%c0_18, %c768], %28 {strides = array<i32>} : memref<32x1280xbf16, #tpu.memory_space<vmem>>, vector<32x128xbf16>,
    %30 = vector.extract_strided_slice %23 {offsets = [64, 0], sizes = [32, 128], strides = [1, 1]} : vector<128x128xf32> to vector<32x128xf32>
    %31 = arith.truncf %30 : vector<32x128xf32> to vector<32x128xbf16>
    %c0_19 = arith.constant 0 : index
    %c896 = arith.constant 896 : index
    %32 = vector.load %arg11[%c0_19, %c896] : memref<32x1280xbf16, #tpu.memory_space<vmem>>, vector<32x128xbf16>
    tpu.vector_store %arg11[%c0_19, %c896], %31 {strides = array<i32>} : memref<32x1280xbf16, #tpu.memory_space<vmem>>, vector<32x128xbf16>,
    %33 = vector.extract_strided_slice %23 {offsets = [96, 0], sizes = [32, 128], strides = [1, 1]} : vector<128x128xf32> to vector<32x128xf32>
    %34 = arith.truncf %33 : vector<32x128xf32> to vector<32x128xbf16>
    %c0_20 = arith.constant 0 : index
    %c1024 = arith.constant 1024 : index
    %35 = vector.load %arg11[%c0_20, %c1024] : memref<32x1280xbf16, #tpu.memory_space<vmem>>, vector<32x128xbf16>
    tpu.vector_store %arg11[%c0_20, %c1024], %34 {strides = array<i32>} : memref<32x1280xbf16, #tpu.memory_space<vmem>>, vector<32x128xbf16>,
    %c0_21 = arith.constant 0 : index
    %c0_22 = arith.constant 0 : index
    %c0_23 = arith.constant 0 : index
    %36 = vector.load %arg2[%c0_21, %c0_22, %c0_23] : memref<3x16x32xbf16, #tpu.memory_space<vmem>>, vector<1x16x32xbf16>
    %37 = vector.shape_cast %36 : vector<1x16x32xbf16> to vector<16x32xbf16>
    %c0_24 = arith.constant 0 : index
    %c0_25 = arith.constant 0 : index
    %38 = vector.load %arg11[%c0_24, %c0_25] : memref<32x1280xbf16, #tpu.memory_space<vmem>>, vector<32x1024xbf16>
    %cst_26 = arith.constant dense<0.000000e+00> : vector<16x1024xf32>
    %39 = tpu.matmul %37, %38, %cst_26 {dimension_numbers = #tpu.dot_dimension_numbers<[1], [0], [0], [1], [0, 0, 1, 1], [], []>} : vector<16x32xbf16>, vector<32x1024xbf16>, vector<16x1024xf32> -> vector<16x1024xf32>
    %c1 = arith.constant 1 : index
    %c0_27 = arith.constant 0 : index
    %c0_28 = arith.constant 0 : index
    %40 = vector.load %arg2[%c1, %c0_27, %c0_28] : memref<3x16x32xbf16, #tpu.memory_space<vmem>>, vector<1x16x32xbf16>
    %41 = vector.shape_cast %40 : vector<1x16x32xbf16> to vector<16x32xbf16>
    %c0_29 = arith.constant 0 : index
    %c128_30 = arith.constant 128 : index
    %42 = vector.load %arg11[%c0_29, %c128_30] : memref<32x1280xbf16, #tpu.memory_space<vmem>>, vector<32x1024xbf16>
    %cst_31 = arith.constant dense<0.000000e+00> : vector<16x1024xf32>
    %43 = tpu.matmul %41, %42, %cst_31 {dimension_numbers = #tpu.dot_dimension_numbers<[1], [0], [0], [1], [0, 0, 1, 1], [], []>} : vector<16x32xbf16>, vector<32x1024xbf16>, vector<16x1024xf32> -> vector<16x1024xf32>
    %44 = arith.addf %39, %43 : vector<16x1024xf32>
    %c2 = arith.constant 2 : index
    %c0_32 = arith.constant 0 : index
    %c0_33 = arith.constant 0 : index
    %45 = vector.load %arg2[%c2, %c0_32, %c0_33] : memref<3x16x32xbf16, #tpu.memory_space<vmem>>, vector<1x16x32xbf16>
    %46 = vector.shape_cast %45 : vector<1x16x32xbf16> to vector<16x32xbf16>
    %c0_34 = arith.constant 0 : index
    %c256_35 = arith.constant 256 : index
    %47 = vector.load %arg11[%c0_34, %c256_35] : memref<32x1280xbf16, #tpu.memory_space<vmem>>, vector<32x1024xbf16>
    %cst_36 = arith.constant dense<0.000000e+00> : vector<16x1024xf32>
    %48 = tpu.matmul %46, %47, %cst_36 {dimension_numbers = #tpu.dot_dimension_numbers<[1], [0], [0], [1], [0, 0, 1, 1], [], []>} : vector<16x32xbf16>, vector<32x1024xbf16>, vector<16x1024xf32> -> vector<16x1024xf32>
    %49 = arith.addf %44, %48 : vector<16x1024xf32>
    %c0_37 = arith.constant 0 : index
    %c0_38 = arith.constant 0 : index
    %50 = vector.load %arg3[%c0_37, %c0_38] : memref<16x1xf32, #tpu.memory_space<vmem>>, vector<16x1xf32>
    %51 = vector.broadcast %50 : vector<16x1xf32> to vector<16x1024xf32>
    %52 = arith.addf %49, %51 : vector<16x1024xf32>
    %cst_39 = arith.constant 0.000000e+00 : f32
    %53 = vector.broadcast %cst_39 : f32 to vector<16x1024xf32>
    %54 = arith.maximumf %52, %53 : vector<16x1024xf32>
    %55 = arith.truncf %54 : vector<16x1024xf32> to vector<16x1024xbf16>
    %c0_40 = arith.constant 0 : index
    %c128_41 = arith.constant 128 : index
    %56 = vector.load %arg12[%c0_40, %c128_41] : memref<16x1280xbf16, #tpu.memory_space<vmem>>, vector<16x1024xbf16>
    tpu.vector_store %arg12[%c0_40, %c128_41], %55 {strides = array<i32>} : memref<16x1280xbf16, #tpu.memory_space<vmem>>, vector<16x1024xbf16>,
    %c0_42 = arith.constant 0 : index
    %c0_43 = arith.constant 0 : index
    %c0_44 = arith.constant 0 : index
    %57 = vector.load %arg4[%c0_42, %c0_43, %c0_44] : memref<3x16x16xbf16, #tpu.memory_space<vmem>>, vector<1x16x16xbf16>
    %58 = vector.shape_cast %57 : vector<1x16x16xbf16> to vector<16x16xbf16>
    %c0_45 = arith.constant 0 : index
    %c0_46 = arith.constant 0 : index
    %59 = vector.load %arg12[%c0_45, %c0_46] : memref<16x1280xbf16, #tpu.memory_space<vmem>>, vector<16x1024xbf16>
    %cst_47 = arith.constant dense<0.000000e+00> : vector<16x1024xf32>
    %60 = tpu.matmul %58, %59, %cst_47 {dimension_numbers = #tpu.dot_dimension_numbers<[1], [0], [0], [1], [0, 0, 1, 1], [], []>} : vector<16x16xbf16>, vector<16x1024xbf16>, vector<16x1024xf32> -> vector<16x1024xf32>
    %c1_48 = arith.constant 1 : index
    %c0_49 = arith.constant 0 : index
    %c0_50 = arith.constant 0 : index
    %61 = vector.load %arg4[%c1_48, %c0_49, %c0_50] : memref<3x16x16xbf16, #tpu.memory_space<vmem>>, vector<1x16x16xbf16>
    %62 = vector.shape_cast %61 : vector<1x16x16xbf16> to vector<16x16xbf16>
    %c0_51 = arith.constant 0 : index
    %c128_52 = arith.constant 128 : index
    %63 = vector.load %arg12[%c0_51, %c128_52] : memref<16x1280xbf16, #tpu.memory_space<vmem>>, vector<16x1024xbf16>
    %cst_53 = arith.constant dense<0.000000e+00> : vector<16x1024xf32>
    %64 = tpu.matmul %62, %63, %cst_53 {dimension_numbers = #tpu.dot_dimension_numbers<[1], [0], [0], [1], [0, 0, 1, 1], [], []>} : vector<16x16xbf16>, vector<16x1024xbf16>, vector<16x1024xf32> -> vector<16x1024xf32>
    %65 = arith.addf %60, %64 : vector<16x1024xf32>
    %c2_54 = arith.constant 2 : index
    %c0_55 = arith.constant 0 : index
    %c0_56 = arith.constant 0 : index
    %66 = vector.load %arg4[%c2_54, %c0_55, %c0_56] : memref<3x16x16xbf16, #tpu.memory_space<vmem>>, vector<1x16x16xbf16>
    %67 = vector.shape_cast %66 : vector<1x16x16xbf16> to vector<16x16xbf16>
    %c0_57 = arith.constant 0 : index
    %c256_58 = arith.constant 256 : index
    %68 = vector.load %arg12[%c0_57, %c256_58] : memref<16x1280xbf16, #tpu.memory_space<vmem>>, vector<16x1024xbf16>
    %cst_59 = arith.constant dense<0.000000e+00> : vector<16x1024xf32>
    %69 = tpu.matmul %67, %68, %cst_59 {dimension_numbers = #tpu.dot_dimension_numbers<[1], [0], [0], [1], [0, 0, 1, 1], [], []>} : vector<16x16xbf16>, vector<16x1024xbf16>, vector<16x1024xf32> -> vector<16x1024xf32>
    %70 = arith.addf %65, %69 : vector<16x1024xf32>
    %c0_60 = arith.constant 0 : index
    %c0_61 = arith.constant 0 : index
    %71 = vector.load %arg5[%c0_60, %c0_61] : memref<16x1xf32, #tpu.memory_space<vmem>>, vector<16x1xf32>
    %72 = vector.broadcast %71 : vector<16x1xf32> to vector<16x1024xf32>
    %73 = arith.addf %70, %72 : vector<16x1024xf32>
    %cst_62 = arith.constant 0.000000e+00 : f32
    %74 = vector.broadcast %cst_62 : f32 to vector<16x1024xf32>
    %75 = arith.maximumf %73, %74 : vector<16x1024xf32>
    %76 = vector.extract_strided_slice %75 {offsets = [0, 0], sizes = [16, 128], strides = [1, 1]} : vector<16x1024xf32> to vector<16x128xf32>
    %77 = vector.extract_strided_slice %75 {offsets = [0, 128], sizes = [16, 128], strides = [1, 1]} : vector<16x1024xf32> to vector<16x128xf32>
    %78 = arith.maximumf %76, %77 : vector<16x128xf32>
    %79 = vector.extract_strided_slice %75 {offsets = [0, 256], sizes = [16, 128], strides = [1, 1]} : vector<16x1024xf32> to vector<16x128xf32>
    %80 = arith.maximumf %78, %79 : vector<16x128xf32>
    %81 = vector.extract_strided_slice %75 {offsets = [0, 384], sizes = [16, 128], strides = [1, 1]} : vector<16x1024xf32> to vector<16x128xf32>
    %82 = arith.maximumf %80, %81 : vector<16x128xf32>
    %83 = vector.extract_strided_slice %75 {offsets = [0, 512], sizes = [16, 128], strides = [1, 1]} : vector<16x1024xf32> to vector<16x128xf32>
    %84 = arith.maximumf %82, %83 : vector<16x128xf32>
    %85 = vector.extract_strided_slice %75 {offsets = [0, 640], sizes = [16, 128], strides = [1, 1]} : vector<16x1024xf32> to vector<16x128xf32>
    %86 = arith.maximumf %84, %85 : vector<16x128xf32>
    %87 = vector.extract_strided_slice %75 {offsets = [0, 768], sizes = [16, 128], strides = [1, 1]} : vector<16x1024xf32> to vector<16x128xf32>
    %88 = arith.maximumf %86, %87 : vector<16x128xf32>
    %89 = vector.extract_strided_slice %75 {offsets = [0, 896], sizes = [16, 128], strides = [1, 1]} : vector<16x1024xf32> to vector<16x128xf32>
    %90 = arith.maximumf %88, %89 : vector<16x128xf32>
    %c0_63 = arith.constant 0 : index
    %c0_64 = arith.constant 0 : index
    %91 = vector.load %arg6[%c0_63, %c0_64] : memref<8x16xbf16, #tpu.memory_space<vmem>>, vector<8x16xbf16>
    %92 = arith.truncf %90 : vector<16x128xf32> to vector<16x128xbf16>
    %cst_65 = arith.constant dense<0.000000e+00> : vector<8x128xf32>
    %93 = tpu.matmul %91, %92, %cst_65 {dimension_numbers = #tpu.dot_dimension_numbers<[1], [0], [0], [1], [0, 0, 1, 1], [], []>} : vector<8x16xbf16>, vector<16x128xbf16>, vector<8x128xf32> -> vector<8x128xf32>
    %c0_66 = arith.constant 0 : index
    %c0_67 = arith.constant 0 : index
    %94 = vector.load %arg7[%c0_66, %c0_67] : memref<8x1xf32, #tpu.memory_space<vmem>>, vector<8x1xf32>
    %95 = vector.broadcast %94 : vector<8x1xf32> to vector<8x128xf32>
    %96 = arith.addf %93, %95 : vector<8x128xf32>
    %cst_68 = arith.constant 0.000000e+00 : f32
    %97 = vector.broadcast %cst_68 : f32 to vector<8x128xf32>
    %98 = arith.maximumf %96, %97 : vector<8x128xf32>
    %c0_69 = arith.constant 0 : index
    %c0_70 = arith.constant 0 : index
    %99 = vector.load %arg8[%c0_69, %c0_70] : memref<1x8xbf16, #tpu.memory_space<vmem>>, vector<1x8xbf16>
    %100 = arith.truncf %98 : vector<8x128xf32> to vector<8x128xbf16>
    %cst_71 = arith.constant dense<0.000000e+00> : vector<1x128xf32>
    %101 = tpu.matmul %99, %100, %cst_71 {dimension_numbers = #tpu.dot_dimension_numbers<[1], [0], [0], [1], [0, 0, 1, 1], [], []>} : vector<1x8xbf16>, vector<8x128xbf16>, vector<1x128xf32> -> vector<1x128xf32>
    %c0_72 = arith.constant 0 : index
    %c0_73 = arith.constant 0 : index
    %102 = vector.load %arg9[%c0_72, %c0_73] : memref<1x1xf32, #tpu.memory_space<vmem>>, vector<1x1xf32>
    %103 = vector.broadcast %102 : vector<1x1xf32> to vector<1x128xf32>
    %104 = arith.addf %101, %103 : vector<1x128xf32>
    %c0_74 = arith.constant 0 : index
    %c0_75 = arith.constant 0 : index
    %105 = vector.load %arg10[%c0_74, %c0_75] : memref<1x128xf32, #tpu.memory_space<vmem>>, vector<1x128xf32>
    tpu.vector_store %arg10[%c0_74, %c0_75], %104 {strides = array<i32>} : memref<1x128xf32, #tpu.memory_space<vmem>>, vector<1x128xf32>,
    return
  }
  func.func @transform_0(%arg0: i32) -> (i32, i32) {
    %c0_i32 = arith.constant 0 : i32
    %c0_i32_0 = arith.constant 0 : i32
    return %arg0, %c0_i32 : i32, i32
  }
  func.func @transform_1(%arg0: i32) -> (i32, i32, i32) {
    %c0_i32 = arith.constant 0 : i32
    %c0_i32_0 = arith.constant 0 : i32
    %c0_i32_1 = arith.constant 0 : i32
    %c0_i32_2 = arith.constant 0 : i32
    return %c0_i32, %c0_i32_0, %c0_i32_1 : i32, i32, i32
  }
  func.func @transform_2(%arg0: i32) -> (i32, i32) {
    %c0_i32 = arith.constant 0 : i32
    %c0_i32_0 = arith.constant 0 : i32
    %c0_i32_1 = arith.constant 0 : i32
    return %c0_i32, %c0_i32_0 : i32, i32
  }
  func.func @transform_3(%arg0: i32) -> (i32, i32, i32) {
    %c0_i32 = arith.constant 0 : i32
    %c0_i32_0 = arith.constant 0 : i32
    %c0_i32_1 = arith.constant 0 : i32
    %c0_i32_2 = arith.constant 0 : i32
    return %c0_i32, %c0_i32_0, %c0_i32_1 : i32, i32, i32
  }
  func.func @transform_4(%arg0: i32) -> (i32, i32) {
    %c0_i32 = arith.constant 0 : i32
    %c0_i32_0 = arith.constant 0 : i32
    %c0_i32_1 = arith.constant 0 : i32
    return %c0_i32, %c0_i32_0 : i32, i32
  }
  func.func @transform_5(%arg0: i32) -> (i32, i32) {
    %c0_i32 = arith.constant 0 : i32
    %c0_i32_0 = arith.constant 0 : i32
    %c0_i32_1 = arith.constant 0 : i32
    return %c0_i32, %c0_i32_0 : i32, i32
  }
  func.func @transform_6(%arg0: i32) -> (i32, i32) {
    %c0_i32 = arith.constant 0 : i32
    %c0_i32_0 = arith.constant 0 : i32
    %c0_i32_1 = arith.constant 0 : i32
    return %c0_i32, %c0_i32_0 : i32, i32
  }
  func.func @transform_7(%arg0: i32) -> (i32, i32) {
    %c0_i32 = arith.constant 0 : i32
    %c0_i32_0 = arith.constant 0 : i32
    %c0_i32_1 = arith.constant 0 : i32
    return %c0_i32, %c0_i32_0 : i32, i32
  }
  func.func @transform_8(%arg0: i32) -> (i32, i32) {
    %c0_i32 = arith.constant 0 : i32
    %c0_i32_0 = arith.constant 0 : i32
    %c0_i32_1 = arith.constant 0 : i32
    return %c0_i32, %c0_i32_0 : i32, i32
  }
  func.func @transform_9(%arg0: i32) -> (i32, i32) {
    %c0_i32 = arith.constant 0 : i32
    %c0_i32_0 = arith.constant 0 : i32
    return %c0_i32, %arg0 : i32, i32
  }
}

</mosaic_0001>

<bundles_post_ra>
// kernel: tpu_custom_call.1
= control target key start
LH: loop header
LB: loop body
LE: loop exit
PB: predicated region body
PF: predicated region fallthrough
CT: control target
= control target key end

     0   :  { %s2197_s0 = inlined_call_operand.hbm [shape: f32[128,256], index: 0, kind: input, shape index: {}]   ;;  %s2198_s1 = inlined_call_operand.vmem [shape: bf16[3,16,32], index: 1, kind: input, shape index: {}]   ;;  %s2199_s2 = inlined_call_operand.vmem [shape: f32[16,1], index: 2, kind: input, shape index: {}]   ;;  %s2200_s3 = inlined_call_operand.vmem [shape: bf16[3,16,16], index: 3, kind: input, shape index: {}]   ;;  %s2201_s4 = inlined_call_operand.vmem [shape: f32[16,1], index: 4, kind: input, shape index: {}]   ;;  %s2202_s5 = inlined_call_operand.vmem [shape: bf16[8,16], index: 5, kind: input, shape index: {}]   ;;  %s2203_s6 = inlined_call_operand.vmem [shape: f32[8,1], index: 6, kind: input, shape index: {}]   ;;  %s2204_s7 = inlined_call_operand.vmem [shape: bf16[1,8], index: 7, kind: input, shape index: {}]   ;;  %s2205_s8 = inlined_call_operand.<no memory space> [shape: f32[1,1], index: 8, kind: input, shape index: {}]   ;;  %s2206_s9 = inlined_call_operand.hbm [shape: f32[1,128], index: 9, kind: output, shape index: {}]  }
   0x1   :  { %v14_v0 = vstv %s2205_s8 }
   0x2   :  { %15 = vst [vmem:[#allocation4] sm:$0x1] %v14_v0 }
   0x3   :  { %16 = vsyncpa [#allocation6], 0 }
   0x4   :  { %17 = vsyncpa [#allocation7], 0  ;;  %s1917_s11 = smov [#allocation5]   ;;  %s1869_s15 = scalar_lea.hbm %s2197_s0, 4096 }
   0x5   :  { %s23_s12 = sshll.u32 %s1917_s11, 4  ;;  %p1870_p0 = scmp.ne.s32.totalorder %s2197_s0, %s1869_s15  ;;  %s24_s12 = int_to_ptr.vmem [resolvable:$true] %s23_s12 }
   0x6   :  { %p1873_p1 = scmp.lt.u32.totalorder %s1869_s15, %s2197_s0 }
   0x8   :  { %p1875_p2 = pnand %p1873_p1, %p1870_p0 }
   0xa   :  { %1878 = shalt.err (!%p1875_p2)
}
   0xb   :  { %s1879_s8 = scalar_lea.vmem %s24_s12, 4096  ;;  %p1884_p4 = scmp.lt.s32.totalorder %s24_s12, %s24_s12 }
   0xc   :  { %p1880_p3 = scmp.ne.s32.totalorder %s24_s12, %s1879_s8  ;;  %p1885_p5 = scmp.lt.s32.totalorder %s1879_s8, %s1879_s8 }
   0xe   :  { %p1886_p6 = por %p1885_p5, %p1884_p4 }
  0x10   :  { %p1887_p7 = pnand %p1886_p6, %p1880_p3 }
  0x12   :  { %1890 = shalt.err (!%p1887_p7)
}
  0x13   :  { %s1918_s20 = smov 256   ;;  %s1919_s21 = smov 16  }
  0x14   :  { %29 = dma.hbm_to_vmem [thread:$0]  %s2197_s0, 4096, %s24_s12, [#allocation6], %s1918_s20, %s1918_s20, %s1919_s21  }
  0x15   :  { %1913 = dma.done.wait [#allocation6], 4096  }
  0x16   :  { %1914 = vsyncadd [#allocation6], 4294963200  ;;  %v56_v1 = vld [vmem:[#allocation5] sm:$0xff]  ;;  %v120_v2 = vld [vmem:[#allocation5 + $0x8] sm:$0xff]  ;;  %v1920_v36 = vmov 0   ;;  %vm212_vm0 = vcmask 261120  }
  0x17   :  { %v57_v3 = vld [vmem:[#allocation5 + $0x10] sm:$0xff]  ;;  %v1749_v4 = vpack.i.bf16 %v120_v2, %v56_v1  ;;  %v121_v5 = vld [vmem:[#allocation5 + $0x18] sm:$0xff]  ;;  %v58_v7 = vld [vmem:[#allocation5 + $0x20] sm:$0xff]  ;;  %248 = vmatprep.mubr.bf16.mxu0 %v1920_v36  ;;  %291 = vmatprep.mubr.bf16.mxu1 %v1920_v36  ;;  %vm1922_vm1 = vmmov 0   ;;  %vm862_vm2 = vcmask 130048   ;;  %vm1551_vm3 = vcmask 1043456  }
  0x18   :  { %v1751_v6 = vpack.i.bf16 %v121_v5, %v57_v3  ;;  %v122_v8 = vld [vmem:[#allocation5 + $0x28] sm:$0xff]  ;;  %v59_v10 = vld [vmem:[#allocation5 + $0x30] sm:$0xff]  ;;  %v123_v11 = vld [vmem:[#allocation5 + $0x38] sm:$0xff]  ;;  %1861 = vset.pattern.permute.xlu1 %v1920_v36  ;;  %vm1547_vm4 = vcmask 64512  }
  0x19   :  { %1750 = vxpose.xlu0.b32.start [1/16] %v1749_v4, 128  ;;  %v1753_v9 = vpack.i.bf16 %v122_v8, %v58_v7  ;;  %v60_v12 = vld [vmem:[#allocation5 + $0x40] sm:$0xff]  ;;  %v124_v13 = vld [vmem:[#allocation5 + $0x48] sm:$0xff]  ;;  %v1755_v14 = vpack.i.bf16 %v123_v11, %v59_v10  ;;  %v61_v16 = vld [vmem:[#allocation5 + $0x50] sm:$0xff] }
  0x1a   :  { %v1757_v15 = vpack.i.bf16 %v124_v13, %v60_v12  ;;  %v125_v17 = vld [vmem:[#allocation5 + $0x58] sm:$0xff]  ;;  %v62_v19 = vld [vmem:[#allocation5 + $0x60] sm:$0xff]  ;;  %v126_v20 = vld [vmem:[#allocation5 + $0x68] sm:$0xff] }
  0x1b   :  { %v1759_v18 = vpack.i.bf16 %v125_v17, %v61_v16  ;;  %v1761_v21 = vpack.i.bf16 %v126_v20, %v62_v19  ;;  %v63_v22 = vld [vmem:[#allocation5 + $0x70] sm:$0xff]  ;;  %v127_v23 = vld [vmem:[#allocation5 + $0x78] sm:$0xff]  ;;  %v64_v25 = vld [vmem:[#allocation5 + $0x80] sm:$0xff] }
  0x1c   :  { %v1763_v24 = vpack.i.bf16 %v127_v23, %v63_v22  ;;  %v128_v26 = vld [vmem:[#allocation5 + $0x88] sm:$0xff]  ;;  %v65_v28 = vld [vmem:[#allocation5 + $0x90] sm:$0xff]  ;;  %v129_v29 = vld [vmem:[#allocation5 + $0x98] sm:$0xff] }
  0x1d   :  { %1752 = vxpose.xlu0.b32.cont [2/16] %v1751_v6, 128  ;;  %v1765_v27 = vpack.i.bf16 %v128_v26, %v64_v25  ;;  %v1767_v30 = vpack.i.bf16 %v129_v29, %v65_v28  ;;  %v66_v31 = vld [vmem:[#allocation5 + $0xa0] sm:$0xff]  ;;  %v130_v32 = vld [vmem:[#allocation5 + $0xa8] sm:$0xff]  ;;  %v67_v34 = vld [vmem:[#allocation5 + $0xb0] sm:$0xff] }
  0x1e   :  { %v1769_v33 = vpack.i.bf16 %v130_v32, %v66_v31  ;;  %v131_v35 = vld [vmem:[#allocation5 + $0xb8] sm:$0xff]  ;;  %v68_v38 = vld [vmem:[#allocation5 + $0xc0] sm:$0xff]  ;;  %v132_v39 = vld [vmem:[#allocation5 + $0xc8] sm:$0xff] }
  0x1f   :  { %v1771_v37 = vpack.i.bf16 %v131_v35, %v67_v34  ;;  %v1773_v40 = vpack.i.bf16 %v132_v39, %v68_v38  ;;  %v69_v41 = vld [vmem:[#allocation5 + $0xd0] sm:$0xff]  ;;  %v133_v42 = vld [vmem:[#allocation5 + $0xd8] sm:$0xff]  ;;  %v70_v44 = vld [vmem:[#allocation5 + $0xe0] sm:$0xff] }
  0x20   :  { %v1775_v43 = vpack.i.bf16 %v133_v42, %v69_v41  ;;  %v134_v45 = vld [vmem:[#allocation5 + $0xe8] sm:$0xff]  ;;  %v71_v47 = vld [vmem:[#allocation5 + $0xf0] sm:$0xff]  ;;  %v135_v48 = vld [vmem:[#allocation5 + $0xf8] sm:$0xff] }
  0x21   :  { %1754 = vxpose.xlu0.b32.cont [3/16] %v1753_v9, 128  ;;  %v1777_v46 = vpack.i.bf16 %v134_v45, %v70_v44  ;;  %v1779_v49 = vpack.i.bf16 %v135_v48, %v71_v47  ;;  %v783_v50 = vld [vmem:[%s2199_s2] sm:$0xff]  ;;  %v784_v51 = vld [vmem:[%s2199_s2 + $0x8] sm:$0xff] }
  0x22   :  { %787 = vperm.xlu1 %1861, %v783_v50   ;;  %v1425_v52 = vld [vmem:[%s2201_s4] sm:$0xff]  ;;  %v1426_v53 = vld [vmem:[%s2201_s4 + $0x8] sm:$0xff] }
  0x23   :  { %v1485_v54 = vld [vmem:[%s2203_s6] sm:$0xff] }
  0x24   :  { %v1537_v55 = vld [vmem:[#allocation4] sm:$0x1] }
  0x25   :  { %1756 = vxpose.xlu0.b32.cont [4/16] %v1755_v14, 128 }
  0x26   :  { %792 = vperm.xlu1 %1861, %v784_v51  }
  0x29   :  { %1758 = vxpose.xlu0.b32.cont [5/16] %v1757_v15, 128 }
  0x2a   :  { %1429 = vperm.xlu1 %1861, %v1425_v52  }
  0x2d   :  { %1760 = vxpose.xlu0.b32.cont [6/16] %v1759_v18, 128  ;;  %v2021_v18 = vld [vmem:[%s2198_s1 + $0x8] sm:$0xff]  }
  0x2e   :  { %1434 = vperm.xlu1 %1861, %v1426_v53  }
  0x31   :  { %1762 = vxpose.xlu0.b32.cont [7/16] %v1761_v21, 128 }
  0x32   :  { %1488 = vperm.xlu1 %1861, %v1485_v54  }
  0x35   :  { %1764 = vxpose.xlu0.b32.cont [8/16] %v1763_v24, 128 }
  0x36   :  { %1540 = vperm.xlu1 %1861, %v1537_v55  }
  0x39   :  { %1766 = vxpose.xlu0.b32.cont [9/16] %v1765_v27, 128 }
  0x3d   :  { %1768 = vxpose.xlu0.b32.cont [10/16] %v1767_v30, 128  ;;  %v2043_v30 = vld [vmem:[%s2198_s1] sm:$0xff]  }
  0x41   :  { %1770 = vxpose.xlu0.b32.cont [11/16] %v1769_v33, 128 }
  0x45   :  { %1772 = vxpose.xlu0.b32.cont [12/16] %v1771_v37, 128 }
  0x49   :  { %1774 = vxpose.xlu0.b32.cont [13/16] %v1773_v40, 128 }
  0x4d   :  { %1776 = vxpose.xlu0.b32.cont [14/16] %v1775_v43, 128 }
  0x51   :  { %1778 = vxpose.xlu0.b32.cont [15/16] %v1777_v46, 128 }
  0x55   :  { %1780 = vxpose.xlu0.b32.end [16/16] %v1779_v49, 128 }
  0x7e   :  { %1862 = vset.pattern.permute.xlu0 %v1920_v36 }
  0x99   :  { %v1781_v56 = vpop.trf.xlu0 }
  0x9a   :  { %v1782_v1 = vunpack.i.l.bf16 %v1781_v56  ;;  %v1785_v19 = vunpack.i.h.bf16 %v1781_v56 }
  0x9d   :  { %v1786_v57 = vpop.trf.xlu0 }
  0x9e   :  { %v1787_v62 = vunpack.i.l.bf16 %v1786_v57  ;;  %v1790_v13 = vunpack.i.h.bf16 %v1786_v57 }
  0xa0   :  { %v104_v4 = vpack.c.bf16 %v1787_v62, %v1782_v1  ;;  %v2024_v23 = vpack.c.bf16 %v1790_v13, %v1785_v19 }
  0xa1   :  { %v1791_v58 = vpop.trf.xlu0 }
  0xa2   :  { %v1792_v10 = vunpack.i.l.bf16 %v1791_v58  ;;  %v1795_v25 = vunpack.i.h.bf16 %v1791_v58 }
  0xa5   :  { %v1796_v59 = vpop.trf.xlu0 }
  0xa6   :  { %v1797_v5 = vunpack.i.l.bf16 %v1796_v59  ;;  %v1800_v21 = vunpack.i.h.bf16 %v1796_v59  ;;  %v1865_v59 = vld [vmem:[%s2198_s1 + $0x10] sm:$0xff]  }
  0xa8   :  { %v105_v15 = vpack.c.bf16 %v1797_v5, %v1792_v10  ;;  %v2033_v27 = vpack.c.bf16 %v1800_v21, %v1795_v25 }
  0xa9   :  { %v1801_v60 = vpop.trf.xlu0 }
  0xaa   :  { %v1802_v63 = vunpack.i.l.bf16 %v1801_v60  ;;  %v1805_v11 = vunpack.i.h.bf16 %v1801_v60  ;;  %v1921_v60 = vmov 0.0  }
  0xad   :  { %v1806_v61 = vpop.trf.xlu0 }
  0xae   :  { %v1807_v0 = vunpack.i.l.bf16 %v1806_v61  ;;  %v1810_v6 = vunpack.i.h.bf16 %v1806_v61  ;;  %v2097_v61 = vpop.permute.xlu1 %787 }
  0xb0   :  { %v2008_v2 = vpack.c.bf16 %v1807_v0, %v1802_v63  ;;  %v2016_v17 = vpack.c.bf16 %v1810_v6, %v1805_v11 }
  0xb1   :  { %v1811_v3 = vpop.trf.xlu0 }
  0xb2   :  { %216 = vmatprep.subr.bf16.mxu0 %v2008_v2  ;;  %v1812_v8 = vunpack.i.l.bf16 %v1811_v3  ;;  %v1815_v20 = vunpack.i.h.bf16 %v1811_v3  ;;  %v2099_v63 = vpop.permute.xlu1 %792 }
  0xb3   :  { %217 = vmatpush1.bf16.msra.mxu0 %v104_v4 }
  0xb5   :  { %v1816_v7 = vpop.trf.xlu0 }
  0xb6   :  { %v1817_v9 = vunpack.i.l.bf16 %v1816_v7  ;;  %v1820_v16 = vunpack.i.h.bf16 %v1816_v7 }
  0xb8   :  { %v2011_v12 = vpack.c.bf16 %v1817_v9, %v1812_v8  ;;  %v2028_v24 = vpack.c.bf16 %v1820_v16, %v1815_v20 }
  0xb9   :  { %v2013_v14 = vpop.trf.xlu0 }
  0xba   :  { %218 = vmatprep.subr.bf16.mxu0 %v2011_v12  ;;  %v1822_v35 = vunpack.i.l.bf16 %v2013_v14  ;;  %v1825_v52 = vunpack.i.h.bf16 %v2013_v14 }
  0xbb   :  { %219 = vmatpush1.bf16.msra.mxu0 %v105_v15 }
  0xbc   :  { %302 = vmatprep.subr.bf16.mxu0 %v2016_v17 }
  0xbd   :  { %v1826_v22 = vpop.trf.xlu0 }
  0xbe   :  { %1614 = vmatmul.mubr.msk.bf16.vlgmr.msra.gmra.mrb[0].mxu0 %vm212_vm0, %v2021_v18  ;;  %v1827_v31 = vunpack.i.l.bf16 %v1826_v22  ;;  %v1830_v48 = vunpack.i.h.bf16 %v1826_v22 }
  0xbf   :  { %303 = vmatpush1.bf16.msra.mxu0 %v2024_v23  ;;  %334 = vmatprep.mubr.bf16.mxu0 %v1920_v36 }
  0xc0   :  { %304 = vmatprep.subr.bf16.mxu0 %v2028_v24  ;;  %v112_v39 = vpack.c.bf16 %v1827_v31, %v1822_v35  ;;  %v176_v55 = vpack.c.bf16 %v1830_v48, %v1825_v52 }
  0xc1   :  { %v1831_v26 = vpop.trf.xlu0 }
  0xc2   :  { %v1832_v45 = vunpack.i.l.bf16 %v1831_v26  ;;  %v1835_v57 = vunpack.i.h.bf16 %v1831_v26 }
  0xc3   :  { %305 = vmatpush1.bf16.msra.mxu0 %v2033_v27 }
  0xc4   :  { %396 = vmatprep.subr.bf16.mxu0 %v104_v4 }
  0xc5   :  { %v1836_v28 = vpop.trf.xlu0 }
  0xc6   :  { %1616 = vmatmul.mubr.msk.bf16.vlgmr.msra.gmra.mrb[4].mxu0 %vm212_vm0, %v2021_v18  ;;  %v1837_v40 = vunpack.i.l.bf16 %v1836_v28  ;;  %v1840_v54 = vunpack.i.h.bf16 %v1836_v28 }
  0xc7   :  { %397 = vmatpush1.bf16.msra.mxu0 %v1920_v36  ;;  %428 = vmatprep.mubr.bf16.mxu0 %v1920_v36 }
  0xc8   :  { %398 = vmatprep.subr.bf16.mxu0 %v105_v15  ;;  %v113_v49 = vpack.c.bf16 %v1837_v40, %v1832_v45  ;;  %v177_v58 = vpack.c.bf16 %v1840_v54, %v1835_v57 }
  0xc9   :  { %v1841_v29 = vpop.trf.xlu0 }
  0xca   :  { %v1842_v33 = vunpack.i.l.bf16 %v1841_v29  ;;  %v1845_v46 = vunpack.i.h.bf16 %v1841_v29 }
  0xcb   :  { %399 = vmatpush1.bf16.msra.mxu0 %v1920_v36 }
  0xcc   :  { %482 = vmatprep.subr.bf16.mxu0 %v2024_v23 }
  0xcd   :  { %v1846_v32 = vpop.trf.xlu0 }
  0xce   :  { %v1847_v34 = vunpack.i.l.bf16 %v1846_v32  ;;  %1619 = vmatmul.mubr.msk.bf16.vlgmr.msra.gmra.mrb[0].mxu0 %vm212_vm0, %v2043_v30  ;;  %v1850_v41 = vunpack.i.h.bf16 %v1846_v32 }
  0xcf   :  { %514 = vmatprep.mubr.bf16.mxu0 %v1920_v36 }
  0xd0   :  { %v2051_v37 = vpack.c.bf16 %v1847_v34, %v1842_v33  ;;  %v180_v51 = vpack.c.bf16 %v1850_v41, %v1845_v46  ;;  %v1867_v41 = vld [vmem:[%s2200_s3] sm:$0xff]  }
  0xd1   :  { %v1851_v38 = vpop.trf.xlu0 }
  0xd2   :  { %259 = vmatprep.subr.bf16.mxu1 %v2051_v37  ;;  %483 = vmatpush1.bf16.msra.mxu0 %v2051_v37  ;;  %v1852_v43 = vunpack.i.l.bf16 %v1851_v38  ;;  %v1855_v53 = vunpack.i.h.bf16 %v1851_v38 }
  0xd3   :  { %260 = vmatpush1.bf16.msra.mxu1 %v112_v39  ;;  %484 = vmatprep.subr.bf16.mxu0 %v2033_v27 }
  0xd5   :  { %v1856_v42 = vpop.trf.xlu0 }
  0xd6   :  { %v1857_v44 = vunpack.i.l.bf16 %v1856_v42  ;;  %v1860_v50 = vunpack.i.h.bf16 %v1856_v42 }
  0xd8   :  { %v117_v47 = vpack.c.bf16 %v1857_v44, %v1852_v43  ;;  %v181_v56 = vpack.c.bf16 %v1860_v50, %v1855_v53 }
  0xda   :  { %261 = vmatprep.subr.bf16.mxu1 %v117_v47  ;;  %485 = vmatpush1.bf16.msra.mxu0 %v117_v47 }
  0xdb   :  { %262 = vmatpush1.bf16.msra.mxu1 %v113_v49  ;;  %595 = vmatprep.subr.bf16.mxu0 %v112_v39 }
  0xdc   :  { %345 = vmatprep.subr.bf16.mxu1 %v180_v51 }
  0xdd   :  { %1621 = vmatmul.mubr.msk.bf16.vlgmr.msra.gmra.mrb[4].mxu0 %vm212_vm0, %v2043_v30 }
  0xde   :  { %1615 = vmatmul.mubr.msk.bf16.vlgmr.msra.gmra.mrb[0].mxu1 %vm212_vm0, %v2021_v18  ;;  %596 = vmatpush1.bf16.msra.mxu0 %v2008_v2 }
  0xdf   :  { %346 = vmatpush1.bf16.msra.mxu1 %v176_v55  ;;  %597 = vmatprep.subr.bf16.mxu0 %v113_v49 }
  0xe0   :  { %347 = vmatprep.subr.bf16.mxu1 %v181_v56  ;;  %627 = vmatprep.mubr.bf16.mxu0 %v1920_v36 }
  0xe1   :  { %377 = vmatprep.mubr.bf16.mxu1 %v1920_v36 }
  0xe2   :  { %598 = vmatpush1.bf16.msra.mxu0 %v2011_v12 }
  0xe3   :  { %348 = vmatpush1.bf16.msra.mxu1 %v177_v58  ;;  %681 = vmatprep.subr.bf16.mxu0 %v176_v55 }
  0xe4   :  { %439 = vmatprep.subr.bf16.mxu1 %v112_v39 }
  0xe5   :  { %1626 = vmatmul.mubr.msk.bf16.vlgmr.msra.gmra.mrb[0].mxu0 %vm212_vm0, %v1865_v59 }
  0xe6   :  { %1617 = vmatmul.mubr.msk.bf16.vlgmr.msra.gmra.mrb[4].mxu1 %vm212_vm0, %v2021_v18  ;;  %682 = vmatpush1.bf16.msra.mxu0 %v2016_v17  ;;  %v2113_v18 = vld [vmem:[%s2200_s3 + $0x8] sm:$0xff]  }
  0xe7   :  { %440 = vmatpush1.bf16.msra.mxu1 %v2008_v2  ;;  %683 = vmatprep.subr.bf16.mxu0 %v177_v58 }
  0xe8   :  { %441 = vmatprep.subr.bf16.mxu1 %v113_v49  ;;  %713 = vmatprep.mubr.bf16.mxu0 %v1920_v36 }
  0xe9   :  { %471 = vmatprep.mubr.bf16.mxu1 %v1920_v36 }
  0xea   :  { %684 = vmatpush1.bf16.msra.mxu0 %v2028_v24 }
  0xeb   :  { %442 = vmatpush1.bf16.msra.mxu1 %v2011_v12 }
  0xec   :  { %525 = vmatprep.subr.bf16.mxu1 %v176_v55 }
  0xed   :  { %1628 = vmatmul.mubr.msk.bf16.vlgmr.msra.gmra.mrb[4].mxu0 %vm212_vm0, %v1865_v59 }
  0xee   :  { %1620 = vmatmul.mubr.msk.bf16.vlgmr.msra.gmra.mrb[0].mxu1 %vm212_vm0, %v2043_v30  ;;  %898 = vmatprep.mubr.bf16.mxu0 %v1920_v36 }
  0xef   :  { %526 = vmatpush1.bf16.msra.mxu1 %v2016_v17  ;;  %557 = vmatprep.mubr.bf16.mxu1 %v1920_v36 }
  0xf0   :  { %527 = vmatprep.subr.bf16.mxu1 %v177_v58 }
  0xf3   :  { %528 = vmatpush1.bf16.msra.mxu1 %v2028_v24 }
  0xf4   :  { %638 = vmatprep.subr.bf16.mxu1 %v2024_v23 }
  0xf6   :  { %1622 = vmatmul.mubr.msk.bf16.vlgmr.msra.gmra.mrb[4].mxu1 %vm212_vm0, %v2043_v30 }
  0xf7   :  { %639 = vmatpush1.bf16.msra.mxu1 %v2051_v37  ;;  %670 = vmatprep.mubr.bf16.mxu1 %v1920_v36 }
  0xf8   :  { %640 = vmatprep.subr.bf16.mxu1 %v2033_v27 }
  0xfb   :  { %641 = vmatpush1.bf16.msra.mxu1 %v117_v47 }
  0xfc   :  { %1660 = vmatprep.subr.bf16.mxu1 %v1921_v60 }
  0xfe   :  { %1627 = vmatmul.mubr.msk.bf16.vlgmr.msra.gmra.mrb[0].mxu1 %vm212_vm0, %v1865_v59 }
  0xff   :  { %1661 = vmatpush3.bf16.msra.mxu1 %v180_v51  ;;  %1664 = vmatprep.mubr.msk.bf16.mxu1 %vm1922_vm1, %v1921_v60 }
 0x100   :  { %1662 = vmatprep.subr.bf16.mxu1 %v1921_v60 }
 0x103   :  { %1663 = vmatpush3.bf16.msra.mxu1 %v181_v56 }
 0x106   :  { %1665 = vmatmul.mubr.msk.bf16.vlgmr.msra.gmra.mrb[8].mxu1 %vm212_vm0, %v1865_v59 }
 0x107   :  { %941 = vmatprep.mubr.bf16.mxu1 %v1920_v36 }
 0x1b8   :  { %v629_v62 = vpop.f32.mrb[0].mxu0 }
 0x1b9   :  { %v795_v0 = vadd.f32 %v2097_v61, %v629_v62  ;;  %v631_v1 = vpop.f32.mrb[1].mxu0 }
 0x1ba   :  { %v796_v2 = vadd.f32 %v2097_v61, %v631_v1  ;;  %v633_v3 = vpop.f32.mrb[2].mxu0 }
 0x1bb   :  { %v803_v4 = vadd.f32 %v2099_v63, %v633_v3  ;;  %v635_v5 = vpop.f32.mrb[3].mxu0  ;;  %v811_v7 = vmax.f32 %v795_v0, 0.0 }
 0x1bc   :  { %v804_v6 = vadd.f32 %v2099_v63, %v635_v5  ;;  %v812_v9 = vmax.f32 %v796_v2, 0.0  ;;  %v1868_v2 = vld [vmem:[%s2200_s3 + $0x10] sm:$0xff]  }
 0x1bd   :  { %v819_v8 = vmax.f32 %v803_v4, 0.0 }
 0x1be   :  { %v820_v10 = vmax.f32 %v804_v6, 0.0 }
 0x1bf   :  { %v827_v11 = vpack.c.bf16 %v819_v8, %v811_v7 }
 0x1c0   :  { %v2105_v12 = vpack.c.bf16 %v820_v10, %v812_v9  ;;  %v715_v13 = vpop.f32.mrb[4].mxu0 }
 0x1c1   :  { %v799_v14 = vadd.f32 %v2097_v61, %v715_v13  ;;  %v717_v15 = vpop.f32.mrb[5].mxu0 }
 0x1c2   :  { %v800_v16 = vadd.f32 %v2097_v61, %v717_v15  ;;  %v719_v17 = vpop.f32.mrb[6].mxu0  ;;  %866 = vmatprep.subr.bf16.mxu0 %v2105_v12 }
 0x1c3   :  { %v807_v19 = vadd.f32 %v2099_v63, %v719_v17  ;;  %v721_v20 = vpop.f32.mrb[7].mxu0  ;;  %867 = vmatpush1.bf16.msra.mxu0 %v827_v11  ;;  %v815_v22 = vmax.f32 %v799_v14, 0.0 }
 0x1c4   :  { %v808_v21 = vadd.f32 %v2099_v63, %v721_v20  ;;  %v816_v24 = vmax.f32 %v800_v16, 0.0 }
 0x1c5   :  { %v823_v23 = vmax.f32 %v807_v19, 0.0 }
 0x1c6   :  { %v824_v25 = vmax.f32 %v808_v21, 0.0  ;;  %1633 = vmatmul.mubr.msk.bf16.vlgmr.msra.gmra.mrb[8].mxu0 %vm862_vm2, %v2113_v18 }
 0x1c7   :  { %v2119_v26 = vpack.c.bf16 %v823_v23, %v815_v22  ;;  %984 = vmatprep.mubr.bf16.mxu0 %v1920_v36 }
 0x1c8   :  { %v2122_v27 = vpack.c.bf16 %v824_v25, %v816_v24 }
 0x1c9   :  { %v559_v28 = vpop.f32.mrb[4].mxu1 }
 0x1ca   :  { %v561_v29 = vpop.f32.mrb[5].mxu1  ;;  %952 = vmatprep.subr.bf16.mxu0 %v2122_v27 }
 0x1cb   :  { %v802_v30 = vadd.f32 %v2097_v61, %v561_v29  ;;  %v563_v31 = vpop.f32.mrb[6].mxu1  ;;  %953 = vmatpush1.bf16.msra.mxu0 %v2119_v26 }
 0x1cc   :  { %v565_v32 = vpop.f32.mrb[7].mxu1  ;;  %1046 = vmatprep.subr.bf16.mxu0 %v827_v11 }
 0x1cd   :  { %v810_v33 = vadd.f32 %v2099_v63, %v565_v32  ;;  %v818_v34 = vmax.f32 %v802_v30, 0.0 }
 0x1ce   :  { %1635 = vmatmul.mubr.msk.bf16.vlgmr.msra.gmra.mrb[12].mxu0 %vm862_vm2, %v2113_v18 }
 0x1cf   :  { %v826_v35 = vmax.f32 %v810_v33, 0.0  ;;  %1047 = vmatpush1.bf16.msra.mxu0 %v1920_v36  ;;  %1078 = vmatprep.mubr.bf16.mxu0 %v1920_v36 }
 0x1d0   :  { %1132 = vmatprep.subr.bf16.mxu0 %v2119_v26 }
 0x1d1   :  { %v834_v37 = vpack.c.bf16 %v826_v35, %v818_v34  ;;  %v672_v38 = vpop.f32.mrb[0].mxu1 }
 0x1d2   :  { %v797_v39 = vadd.f32 %v2097_v61, %v672_v38  ;;  %v674_v40 = vpop.f32.mrb[1].mxu1 }
 0x1d3   :  { %v798_v42 = vadd.f32 %v2097_v61, %v674_v40  ;;  %v676_v43 = vpop.f32.mrb[2].mxu1 }
 0x1d4   :  { %v805_v44 = vadd.f32 %v2099_v63, %v676_v43  ;;  %v678_v45 = vpop.f32.mrb[3].mxu1  ;;  %v813_v47 = vmax.f32 %v797_v39, 0.0 }
 0x1d5   :  { %v806_v46 = vadd.f32 %v2099_v63, %v678_v45  ;;  %v814_v49 = vmax.f32 %v798_v42, 0.0 }
 0x1d6   :  { %v821_v48 = vmax.f32 %v805_v44, 0.0  ;;  %1638 = vmatmul.mubr.msk.bf16.vlgmr.msra.gmra.mrb[8].mxu0 %vm862_vm2, %v1867_v41 }
 0x1d7   :  { %v822_v50 = vmax.f32 %v806_v46, 0.0  ;;  %1164 = vmatprep.mubr.bf16.mxu0 %v1920_v36 }
 0x1d8   :  { %v829_v51 = vpack.c.bf16 %v821_v48, %v813_v47 }
 0x1d9   :  { %v830_v52 = vpack.c.bf16 %v822_v50, %v814_v49  ;;  %v758_v53 = vpop.f32.mrb[8].mxu1 }
 0x1da   :  { %v773_v54 = vadd.f32 %v758_v53, %v559_v28  ;;  %v1666_v55 = vpop.f32.mrb[9].mxu1 }
 0x1db   :  { %v762_v56 = vpop.f32.mrb[10].mxu1  ;;  %909 = vmatprep.subr.bf16.mxu1 %v830_v52  ;;  %1133 = vmatpush1.bf16.msra.mxu0 %v830_v52 }
 0x1dc   :  { %v801_v57 = vadd.f32 %v2097_v61, %v773_v54  ;;  %v781_v58 = vadd.f32 %v762_v56, %v563_v31  ;;  %v1667_v59 = vpop.f32.mrb[11].mxu1  ;;  %910 = vmatpush1.bf16.msra.mxu1 %v829_v51  ;;  %1237 = vmatprep.subr.bf16.mxu0 %v829_v51 }
 0x1dd   :  { %995 = vmatprep.subr.bf16.mxu1 %v834_v37 }
 0x1de   :  { %v809_v62 = vadd.f32 %v2099_v63, %v781_v58  ;;  %1640 = vmatmul.mubr.msk.bf16.vlgmr.msra.gmra.mrb[12].mxu0 %vm862_vm2, %v1867_v41  ;;  %v817_v0 = vmax.f32 %v801_v57, 0.0  ;;  %v1430_v63 = vpop.permute.xlu1 %1429 }
 0x1df   :  { %1634 = vmatmul.mubr.msk.bf16.vlgmr.msra.gmra.mrb[12].mxu1 %vm862_vm2, %v2113_v18  ;;  %1238 = vmatpush1.bf16.msra.mxu0 %v2105_v12 }
 0x1e0   :  { %v825_v1 = vmax.f32 %v809_v62, 0.0  ;;  %1269 = vmatprep.mubr.bf16.mxu0 %v1920_v36  ;;  %1027 = vmatprep.mubr.bf16.mxu1 %v1920_v36 }
 0x1e2   :  { %v833_v61 = vpack.c.bf16 %v825_v1, %v817_v0 }
 0x1e4   :  { %996 = vmatpush1.bf16.msra.mxu1 %v833_v61  ;;  %1323 = vmatprep.subr.bf16.mxu0 %v833_v61 }
 0x1e5   :  { %1089 = vmatprep.subr.bf16.mxu1 %v829_v51 }
 0x1e6   :  { %1645 = vmatmul.mubr.msk.bf16.vlgmr.msra.gmra.mrb[8].mxu0 %vm862_vm2, %v1868_v2 }
 0x1e7   :  { %1324 = vmatpush1.bf16.msra.mxu0 %v2122_v27  ;;  %1636 = vmatmul.mubr.msk.bf16.vlgmr.msra.gmra.mrb[16].mxu1 %vm862_vm2, %v2113_v18 }
 0x1e8   :  { %1090 = vmatpush1.bf16.msra.mxu1 %v2105_v12  ;;  %1355 = vmatprep.mubr.bf16.mxu0 %v1920_v36 }
 0x1e9   :  { %1175 = vmatprep.subr.bf16.mxu1 %v833_v61  ;;  %1121 = vmatprep.mubr.bf16.mxu1 %v1920_v36 }
 0x1ea   :  { %1674 = vmatprep.subr.bf16.mxu0 %v1921_v60 }
 0x1ee   :  { %1647 = vmatmul.mubr.msk.bf16.vlgmr.msra.gmra.mrb[12].mxu0 %vm862_vm2, %v1868_v2 }
 0x1ef   :  { %1639 = vmatmul.mubr.msk.bf16.vlgmr.msra.gmra.mrb[12].mxu1 %vm862_vm2, %v1867_v41  ;;  %1676 = vmatprep.mubr.msk.bf16.mxu0 %vm1922_vm1, %v1921_v60 }
 0x1f0   :  { %1176 = vmatpush1.bf16.msra.mxu1 %v2122_v27  ;;  %1207 = vmatprep.mubr.bf16.mxu1 %v1920_v36 }
 0x1f1   :  { %1280 = vmatprep.subr.bf16.mxu1 %v2119_v26 }
 0x1f7   :  { %1641 = vmatmul.mubr.msk.bf16.vlgmr.msra.gmra.mrb[16].mxu1 %vm862_vm2, %v1867_v41 }
 0x1f8   :  { %1281 = vmatpush1.bf16.msra.mxu1 %v830_v52  ;;  %1312 = vmatprep.mubr.bf16.mxu1 %v1920_v36  ;;  %v1435_v36 = vpop.permute.xlu1 %1434 }
 0x1f9   :  { %1668 = vmatprep.subr.bf16.mxu1 %v1921_v60 }
 0x1ff   :  { %1646 = vmatmul.mubr.msk.bf16.vlgmr.msra.gmra.mrb[12].mxu1 %vm862_vm2, %v1868_v2 }
 0x200   :  { %1669 = vmatpush3.bf16.msra.mxu1 %v834_v37  ;;  %1670 = vmatprep.mubr.msk.bf16.mxu1 %vm1922_vm1, %v1921_v60 }
 0x201   :  { %1680 = vmatprep.subr.bf16.mxu1 %v1921_v60 }
 0x207   :  { %1671 = vmatmul.mubr.msk.bf16.vlgmr.msra.gmra.mrb[20].mxu1 %vm862_vm2, %v1868_v2 }
 0x208   :  { %1682 = vmatprep.mubr.msk.bf16.mxu1 %vm1922_vm1, %v1921_v60 }
 0x2b9   :  { %v1271_v3 = vpop.f32.mrb[8].mxu0 }
 0x2ba   :  { %v1437_v4 = vadd.f32 %v1430_v63, %v1271_v3  ;;  %v1273_v5 = vpop.f32.mrb[9].mxu0 }
 0x2bb   :  { %v1438_v6 = vadd.f32 %v1430_v63, %v1273_v5  ;;  %v1275_v7 = vpop.f32.mrb[10].mxu0 }
 0x2bc   :  { %v1453_v8 = vmax.f32 %v1437_v4, 0.0  ;;  %v1445_v9 = vadd.f32 %v1435_v36, %v1275_v7  ;;  %v1277_v10 = vpop.f32.mrb[11].mxu0 }
 0x2bd   :  { %v1454_v11 = vmax.f32 %v1438_v6, 0.0  ;;  %v1446_v12 = vadd.f32 %v1435_v36, %v1277_v10  ;;  %v1489_v10 = vpop.permute.xlu1 %1488 }
 0x2be   :  { %v1461_v13 = vmax.f32 %v1445_v9, 0.0 }
 0x2bf   :  { %v1469_v14 = vmax.f32 %v1453_v8, %v1454_v11  ;;  %v1462_v15 = vmax.f32 %v1446_v12, 0.0 }
 0x2c1   :  { %v1470_v16 = vmax.f32 %v1461_v13, %v1462_v15  ;;  %v1357_v17 = vpop.f32.mrb[12].mxu0 }
 0x2c2   :  { %v1359_v18 = vpop.f32.mrb[13].mxu0  ;;  %v1441_v29 = vadd.f32 %v1430_v63, %v1357_v17 }
 0x2c3   :  { %v1361_v19 = vpop.f32.mrb[14].mxu0  ;;  %v1442_v33 = vadd.f32 %v1430_v63, %v1359_v18  ;;  %v1535_v18 = vld [vmem:[%s2204_s7] sm:$0x1] }
 0x2c4   :  { %v1363_v60 = vpop.f32.mrb[15].mxu0  ;;  %v1449_v37 = vadd.f32 %v1435_v36, %v1361_v19  ;;  %v1457_v42 = vmax.f32 %v1441_v29, 0.0  ;;  %v1543_v19 = vlaneseq }
 0x2c5   :  { %v1450_v40 = vadd.f32 %v1435_v36, %v1363_v60  ;;  %v1458_v45 = vmax.f32 %v1442_v33, 0.0 }
 0x2c6   :  { %v1465_v47 = vmax.f32 %v1449_v37, 0.0  ;;  %v1544_v60 = vshrl.u32 %v1543_v19, 7 }
 0x2c7   :  { %v1466_v52 = vmax.f32 %v1450_v40, 0.0 }
 0x2ca   :  { %v1209_v20 = vpop.f32.mrb[16].mxu1 }
 0x2cb   :  { %v1211_v21 = vpop.f32.mrb[17].mxu1 }
 0x2cc   :  { %v1213_v22 = vpop.f32.mrb[18].mxu1  ;;  %v1444_v53 = vadd.f32 %v1430_v63, %v1211_v21  ;;  %v1541_v21 = vpop.permute.xlu1 %1540 }
 0x2cd   :  { %v1215_v23 = vpop.f32.mrb[19].mxu1 }
 0x2ce   :  { %v1452_v62 = vadd.f32 %v1435_v36, %v1215_v23  ;;  %v1460_v2 = vmax.f32 %v1444_v53, 0.0 }
 0x2d0   :  { %v1468_v5 = vmax.f32 %v1452_v62, 0.0 }
 0x2d2   :  { %v1314_v24 = vpop.f32.mrb[12].mxu1 }
 0x2d3   :  { %v1439_v25 = vadd.f32 %v1430_v63, %v1314_v24  ;;  %v1316_v26 = vpop.f32.mrb[13].mxu1 }
 0x2d4   :  { %v1440_v27 = vadd.f32 %v1430_v63, %v1316_v26  ;;  %v1318_v28 = vpop.f32.mrb[14].mxu1 }
 0x2d5   :  { %v1455_v30 = vmax.f32 %v1439_v25, 0.0  ;;  %v1447_v31 = vadd.f32 %v1435_v36, %v1318_v28  ;;  %v1320_v32 = vpop.f32.mrb[15].mxu1 }
 0x2d6   :  { %v1456_v34 = vmax.f32 %v1440_v27, 0.0  ;;  %v1448_v35 = vadd.f32 %v1435_v36, %v1320_v32 }
 0x2d7   :  { %v1471_v38 = vmax.f32 %v1469_v14, %v1455_v30  ;;  %v1463_v39 = vmax.f32 %v1447_v31, 0.0 }
 0x2d8   :  { %v1464_v41 = vmax.f32 %v1448_v35, 0.0 }
 0x2d9   :  { %v1473_v43 = vmax.f32 %v1471_v38, %v1456_v34  ;;  %v1472_v44 = vmax.f32 %v1470_v16, %v1463_v39 }
 0x2da   :  { %v1400_v46 = vpop.f32.mrb[20].mxu1 }
 0x2db   :  { %v1475_v48 = vmax.f32 %v1473_v43, %v1457_v42  ;;  %v1474_v49 = vmax.f32 %v1472_v44, %v1464_v41  ;;  %v1415_v50 = vadd.f32 %v1400_v46, %v1209_v20  ;;  %v1672_v51 = vpop.f32.mrb[21].mxu1  ;;  %v1545_v20 = vsub.s32 0, %v1544_v60 }
 0x2dc   :  { %v1404_v54 = vpop.f32.mrb[22].mxu1 }
 0x2dd   :  { %v1476_v55 = vmax.f32 %v1474_v49, %v1465_v47  ;;  %v1443_v56 = vadd.f32 %v1430_v63, %v1415_v50  ;;  %v1477_v57 = vmax.f32 %v1475_v48, %v1458_v45  ;;  %v1423_v58 = vadd.f32 %v1404_v54, %v1213_v22  ;;  %v1673_v59 = vpop.f32.mrb[23].mxu1  ;;  %v1483_v63 = vld [vmem:[%s2202_s5] sm:$0xf]  ;;  %s1923_s5 = smov [#allocation8]  }
 0x2de   :  { %s1602_s22 = sshll.u32 %s1923_s5, 4  ;;  %v1546_v22 = vrot.slane %v1541_v21, %v1545_v20  ;;  %s1603_s22 = int_to_ptr.vmem [resolvable:$true] %s1602_s22 }
 0x2df   :  { %v1459_v0 = vmax.f32 %v1443_v56, 0.0  ;;  %v1451_v1 = vadd.f32 %v1435_v36, %v1423_v58  ;;  %v1478_v61 = vmax.f32 %v1476_v55, %v1466_v52  ;;  %s1891_s23 = scalar_lea.vmem %s1603_s22, 16  ;;  %s1895_s0 = scalar_lea.vmem %s1603_s22, 32 }
 0x2e0   :  { %p1892_p8 = scmp.ne.s32.totalorder %s1603_s22, %s1891_s23  ;;  %p1896_p9 = scmp.lt.s32.totalorder %s1603_s22, %s1603_s22 }
 0x2e1   :  { %v1479_v3 = vmax.f32 %v1477_v57, %v1459_v0  ;;  %v1467_v4 = vmax.f32 %v1451_v1, 0.0  ;;  %p1897_p10 = scmp.lt.s32.totalorder %s1895_s0, %s1891_s23 }
 0x2e3   :  { %v1481_v6 = vmax.f32 %v1479_v3, %v1460_v2  ;;  %v1480_v7 = vmax.f32 %v1478_v61, %v1467_v4  ;;  %p1898_p11 = por %p1897_p10, %p1896_p9 }
 0x2e5   :  { %v1482_v8 = vmax.f32 %v1480_v7, %v1468_v5  ;;  %p1899_p12 = pnand %p1898_p11, %p1892_p8 }
 0x2e7   :  { %v1484_v9 = vpack.c.bf16 %v1482_v8, %v1481_v6 }
 0x2e9   :  { %1675 = vmatpush3.bf16.msra.mxu0 %v1484_v9 }
 0x2ec   :  { %1677 = vmatmul.mubr.msk.bf16.vlgmr.msra.gmra.mrb[16].mxu0 %vm862_vm2, %v1483_v63 }
 0x3bf   :  { %v1528_v11 = vpop.f32.mrb[16].mxu0 }
 0x3c0   :  { %v1529_v12 = vadd.f32 %v1528_v11, %v1489_v10  ;;  %v1678_v36 = vpop.f32.mrb[17].mxu0 }
 0x3c1   :  { %v1531_v13 = vpop.f32.mrb[18].mxu0 }
 0x3c2   :  { %v1534_v14 = vmax.f32 %v1529_v12, 0.0  ;;  %v1679_v15 = vpop.f32.mrb[19].mxu0 }
 0x3c4   :  { %v1536_v16 = vpack.c.bf16 %v1534_v14, %v1534_v14 }
 0x3c6   :  { %v1553_v17 = vsel %vm1551_vm3, %v1536_v16, 0 }
 0x3c7   :  { %1681 = vmatpush3.bf16.msra.mxu1 %v1553_v17 }
 0x3ca   :  { %1683 = vmatmul.mubr.msk.bf16.vlgmr.msra.gmra.mrb[24].mxu1 %vm1547_vm4, %v1535_v18 }
 0x49d   :  { %v1589_v23 = vpop.f32.mrb[24].mxu1 }
 0x49e   :  { %v1590_v24 = vadd.f32 %v1589_v23, %v1546_v22  ;;  %v1684_v25 = vpop.f32.mrb[25].mxu1 }
 0x49f   :  { %v1592_v26 = vpop.f32.mrb[26].mxu1 }
 0x4a0   :  { %1595 = vst [vmem:[#allocation8] sm:$0x1] %v1590_v24  ;;  %v1685_v27 = vpop.f32.mrb[27].mxu1 }
 0x4a1   :  { %1902 = shalt.err (!%p1899_p12)
}
 0x4a2   :  { %s1903_s25 = scalar_lea.hbm %s2206_s9, 16 }
 0x4a3   :  { %p1904_p13 = scmp.ne.s32.totalorder %s2206_s9, %s1903_s25  ;;  %p1907_p0 = scmp.lt.u32.totalorder %s1903_s25, %s2206_s9 }
 0x4a5   :  { %p1909_p1 = pnand %p1907_p0, %p1904_p13 }
 0x4a7   :  { %1912 = shalt.err (!%p1909_p1)
}
 0x4a8   :  { %1605 = dma.vmem_to_hbm [thread:$0]  %s1603_s22, 16, %s2206_s9, [#allocation7]  }
 0x4a9   :  { %1915 = dma.done.wait [#allocation7], 16  }
 0x4aa   :  { %1916 = vsyncadd [#allocation7], 4294967280 }
 0x4ab   :  { %1609 = vsyncpa [#allocation6], 1 }
 0x4ac   :  { %1610 = vsyncpa [#allocation7], 1 }

</bundles_post_ra>
